<compile_context>
chip_gen: v5e
topology: v5e:2x2
jax: 0.10.0
libtpu: 0.0.40
codegen_flags: <defaults>
</compile_context>

<pallas_src>
import functools

import jax
import jax.numpy as jnp
from jax.experimental import pallas as pl
from jax.experimental.pallas import tpu as pltpu

_LANE = 1024                      # lane-dense slab width (multiple of 128)
_MAX_TILE_ROWS = 1024             # (1024, 1024) f32 tile = 4 MiB per buffer
_FUSE_BYTES = 4 * 1024 * 1024     # single-pass VMEM-resident path threshold
_VMEM_LIMIT = 40 << 20            # explicit scoped-VMEM budget for all calls


# --------------------------------------------------------------------------
# fused single-pass kernel (input fits in VMEM): load once, reduce, subtract
# --------------------------------------------------------------------------
def _fused_kernel(x_ref, o_ref, *, inv_n):
    x = x_ref[...]
    total = jnp.sum(x.astype(jnp.float32))          # f32 accumulation
    mean = total * inv_n                            # mul by 1/N, no divide
    # subtract in the input dtype (exact for f32; native bf16 on v6e/v7x,
    # the compiler legalizes bf16 arithmetic on v5e automatically)
    o_ref[...] = x - mean.astype(x.dtype)


# --------------------------------------------------------------------------
# streaming pass 1: per-tile (8, LANE) f32 vector partial sums ("parallel")
# --------------------------------------------------------------------------
def _partial_sum_kernel(x_ref, p_ref):
    x = x_ref[...].astype(jnp.float32)              # (tile_rows, LANE)
    # fold rows into groups of 8 sublanes (aligned with the native (8,128)
    # tiling) and reduce over the group axis: pure VPU adds, no cross-lane
    # XLU reduce and no serial scalar accumulator in the grid loop.
    x3 = x.reshape(x.shape[0] // 8, 8, x.shape[1])
    p_ref[...] = jnp.sum(x3, axis=0)                # (8, LANE) partial


# --------------------------------------------------------------------------
# streaming pass 2: lane-dense tiled subtract, mean as an SMEM scalar
# --------------------------------------------------------------------------
def _sub_kernel(mean_ref, x_ref, o_ref):
    x = x_ref[...]
    o_ref[...] = x - mean_ref[0].astype(x.dtype)


def _pick_tile_rows(rows: int, max_rows: int = _MAX_TILE_ROWS) -> int:
    """Largest divisor of `rows` that is a multiple of 8 and <= max_rows.

    `rows` is always a multiple of 8, so 8 is a guaranteed fallback and the
    scan (at most max_rows/8 trace-time iterations) always terminates.
    """
    t = min(max_rows, rows)
    t -= t % 8
    while t >= 8:
        if rows % t == 0:
            return t
        t -= 8
    return 8


def centered_layer(x: jax.Array) -> jax.Array:
    """Y = X - mean(X) over all elements (any shape), Pallas on TPU."""
    orig_shape = x.shape
    orig_dtype = x.dtype
    n = x.size
    inv_n = 1.0 / float(n)                           # trace-time constant

    # ---- fast path: whole array resident in VMEM, one fused pass ---------
    if n * x.dtype.itemsize <= _FUSE_BYTES:
        return pl.pallas_call(
            functools.partial(_fused_kernel, inv_n=inv_n),
            out_shape=jax.ShapeDtypeStruct(orig_shape, orig_dtype),
            compiler_params=pltpu.CompilerParams(
                vmem_limit_bytes=_VMEM_LIMIT),
        )(x)

    # ---- streaming two-pass path ------------------------------------------
    flat = jnp.ravel(x)                              # free for contiguous x
    rows = pl.cdiv(n, _LANE)
    rows_p = ((rows + 7) // 8) * 8                   # sublane alignment only
    padded = rows_p * _LANE
    ragged = padded != n
    if ragged:
        # Only unaligned element counts pay this copy; aligned large inputs
        # (the common case) go through with zero wrapper-side data movement.
        flat = jnp.pad(flat, (0, padded - n))        # zeros: sum unchanged
    x2 = flat.reshape(rows_p, _LANE)                 # free (metadata only)

    tile_rows = _pick_tile_rows(rows_p)
    n_tiles = rows_p // tile_rows                    # exact: no partial tiles

    # pass 1: per-tile vector partial sums, fully parallel grid
    partials = pl.pallas_call(
        _partial_sum_kernel,
        out_shape=jax.ShapeDtypeStruct((n_tiles * 8, _LANE), jnp.float32),
        grid=(n_tiles,),
        in_specs=[pl.BlockSpec((tile_rows, _LANE), lambda i: (i, 0))],
        out_specs=pl.BlockSpec((8, _LANE), lambda i: (i, 0)),
        compiler_params=pltpu.CompilerParams(
            dimension_semantics=("parallel",),
            vmem_limit_bytes=_VMEM_LIMIT),
    )(x2)

    # tiny final collapse + mean in plain XLA (pairwise, f32)
    mean = (jnp.sum(partials) * inv_n).astype(jnp.float32).reshape(1)

    # pass 2: lane-dense tiled subtract, mean delivered via SMEM
    y2 = pl.pallas_call(
        _sub_kernel,
        out_shape=jax.ShapeDtypeStruct((rows_p, _LANE), orig_dtype),
        grid=(n_tiles,),
        in_specs=[pl.BlockSpec(memory_space=pltpu.MemorySpace.SMEM),
                  pl.BlockSpec((tile_rows, _LANE), lambda i: (i, 0))],
        out_specs=pl.BlockSpec((tile_rows, _LANE), lambda i: (i, 0)),
        compiler_params=pltpu.CompilerParams(
            dimension_semantics=("parallel",),
            vmem_limit_bytes=_VMEM_LIMIT),
    )(mean, x2)

    if ragged:
        return y2.reshape(-1)[:n].reshape(orig_shape)
    return y2.reshape(orig_shape)


if __name__ == "__main__":
    # Module's native shape (2, 20): fused single-pass VMEM-resident path.
    x = jax.random.normal(jax.random.PRNGKey(0), (2, 20), dtype=jnp.float32)
    y = centered_layer(x)
    jax.block_until_ready(y)
    y_ref = x - jnp.mean(x)
    assert y.shape == x.shape and y.dtype == x.dtype
    assert jnp.allclose(y, y_ref, atol=1e-6, rtol=1e-6)
    assert abs(float(jnp.mean(y))) < 1e-5

    # Medium input (4 MiB f32): still the fused single-pass path.
    x_m = jax.random.normal(jax.random.PRNGKey(1), (1024, 1024),
                            dtype=jnp.float32)
    y_m = centered_layer(x_m)
    jax.block_until_ready(y_m)
    assert jnp.allclose(y_m, x_m - jnp.mean(x_m), atol=1e-5, rtol=1e-5)

    # Large aligned input (16 MiB f32): streaming two-pass, zero-copy layout,
    # 4 parallel (1024, 1024) tiles.
    x_b = jax.random.normal(jax.random.PRNGKey(2), (2048, 2048),
                            dtype=jnp.float32)
    y_b = centered_layer(x_b)
    jax.block_until_ready(y_b)
    assert jnp.allclose(y_b, x_b - jnp.mean(x_b), atol=1e-5, rtol=1e-5)

    # Large ragged input (element count not a multiple of 1024): streaming
    # path with the minimal 8-row-aligned pad + tail slice.
    x_r = jax.random.normal(jax.random.PRNGKey(3), (2500, 1000),
                            dtype=jnp.float32)
    y_r = centered_layer(x_r)
    jax.block_until_ready(y_r)
    assert y_r.shape == x_r.shape
    assert jnp.allclose(y_r, x_r - jnp.mean(x_r), atol=1e-5, rtol=1e-5)

    print("KERNEL_OK")
</pallas_src>

<mosaic_0001>
module attributes {stable_mosaic.version = 11 : i64} {
  func.func @_fused_kernel(%arg0: memref<2x20xf32, #tpu.memory_space<vmem>>, %arg1: memref<2x20xf32, #tpu.memory_space<vmem>>) attributes {dimension_semantics = [], scalar_prefetch = 0 : i64, scratch_operands = 0 : i64, tpu.core_type = #tpu.core_type<tc>} {
    %c0 = arith.constant 0 : index
    %c0_0 = arith.constant 0 : index
    %0 = vector.load %arg0[%c0, %c0_0] : memref<2x20xf32, #tpu.memory_space<vmem>>, vector<2x20xf32>
    %1 = vector.shape_cast %0 : vector<2x20xf32> to vector<1x2x20xf32>
    %cst = arith.constant dense<0.000000e+00> : vector<1xf32>
    %2 = vector.multi_reduction <add>, %1, %cst [1, 2] : vector<1x2x20xf32> to vector<1xf32>
    %3 = vector.shape_cast %2 : vector<1xf32> to vector<1x1x1xf32>
    %4 = vector.extract %3[0, 0, 0] : f32 from vector<1x1x1xf32>
    %cst_1 = arith.constant 2.500000e-02 : f32
    %5 = arith.mulf %4, %cst_1 : f32
    %6 = vector.broadcast %5 : f32 to vector<2x20xf32>
    %7 = arith.subf %0, %6 : vector<2x20xf32>
    %c0_2 = arith.constant 0 : index
    %c0_3 = arith.constant 0 : index
    %8 = vector.load %arg1[%c0_2, %c0_3] : memref<2x20xf32, #tpu.memory_space<vmem>>, vector<2x20xf32>
    tpu.vector_store %arg1[%c0_2, %c0_3], %7 {strides = array<i32>} : memref<2x20xf32, #tpu.memory_space<vmem>>, vector<2x20xf32>,
    return
  }
}

</mosaic_0001>

<bundles_post_ra>
// kernel: tpu_custom_call.1
= control target key start
LH: loop header
LB: loop body
LE: loop exit
PB: predicated region body
PF: predicated region fallthrough
CT: control target
= control target key end

     0   :  { %6 = vsyncpa [#allocation3], 0  ;;  %s132_s0 = inlined_call_operand.hbm [shape: f32[2,20], index: 0, kind: input, shape index: {}]   ;;  %s133_s1 = inlined_call_operand.hbm [shape: f32[2,20], index: 1, kind: output, shape index: {}]  }
   0x1   :  { %7 = vsyncpa [#allocation4], 0  ;;  %s13_s8 = sshll.u32 %s132_s0, 4  ;;  %s112_s9 = smov [#allocation2]   ;;  %s14_s8 = int_to_ptr.hbm [resolvable:$true] %s13_s8 }
   0x2   :  { %s15_s10 = sshll.u32 %s112_s9, 4  ;;  %s16_s10 = int_to_ptr.vmem [resolvable:$true] %s15_s10 }
   0x3   :  { %18 = dma.hbm_to_vmem [thread:$0]  %s14_s8, 32, %s16_s10, [#allocation3]  }
   0x4   :  { %108 = dma.done.wait [#allocation3], 32  }
   0x5   :  { %109 = vsyncadd [#allocation3], 4294967264  ;;  %vm24_vm0 = vcmask 156672   ;;  %v23_v0 = vld [vmem:[#allocation2] sm:$0x3]  ;;  %s113_s11 = smov [#allocation5]  }
   0x6   :  { %v25_v1 = vsel %vm24_vm0, %v23_v0, 0.0  ;;  %s44_s12 = sshll.u32 %s113_s11, 4  ;;  %s46_s16 = sshll.u32 %s133_s1, 4  ;;  %s45_s12 = int_to_ptr.vmem [resolvable:$true] %s44_s12  ;;  %s47_s16 = int_to_ptr.hbm [resolvable:$true] %s46_s16 }
   0x7   :  { %26 = vadd.xlane.f32.xlu0 %v25_v1 }
  0x7a   :  { %v27_v2 = vpop.xlane.xlu0 %26 }
  0x7b   :  { %v28_v3 = vrot.slane %v27_v2, 4 }
  0x7d   :  { %v29_v4 = vadd.f32 %v28_v3, %v27_v2 }
  0x7f   :  { %v30_v5 = vrot.slane %v29_v4, 2 }
  0x81   :  { %v31_v6 = vadd.f32 %v30_v5, %v29_v4 }
  0x83   :  { %v32_v7 = vrot.slane %v31_v6, 1 }
  0x85   :  { %v33_v8 = vadd.f32 %v32_v7, %v31_v6 }
  0x87   :  { %56 = vpush %v33_v8 }
  0xb8   :  { %s57_s0 = spop %56 }
  0xb9   :  { %s35_s13 = smul.f32 0.025, %s57_s0 }
  0xbb   :  { %v36_v9 = vstv %s35_s13 }
  0xbc   :  { %v37_v10 = vsub.f32 %v23_v0, %v36_v9 }
  0xbe   :  { %38 = vst.msk [vmem:[#allocation5] sm:$0x3] %vm24_vm0, %v37_v10 }
  0xbf   :  { %49 = dma.vmem_to_hbm [thread:$0]  %s45_s12, 32, %s47_s16, [#allocation4]  }
  0xc0   :  { %110 = dma.done.wait [#allocation4], 32  }
  0xc1   :  { %111 = vsyncadd [#allocation4], 4294967264 }
  0xc2   :  { %54 = vsyncpa [#allocation3], 1 }
  0xc3   :  { %55 = vsyncpa [#allocation4], 1 }

</bundles_post_ra>
